<compile_context>
chip_gen: v6e
topology: v6e:2x2x1
jax: 0.10.0
libtpu: 0.0.40
codegen_flags: <defaults>
</compile_context>

<pallas_src>
import functools

import numpy as np
import jax
import jax.numpy as jnp
from jax.experimental import pallas as pl
from jax.experimental.pallas import tpu as pltpu

_LANE = 128
_MIN_PALLAS_BYTES = 256 * 1024   # below this, a fused XLA max+compare beats kernel launch


@functools.lru_cache(maxsize=1)
def _vmem_budget():
    """(per-block byte budget, scoped-vmem limit) tuned per chip generation."""
    try:
        vmem = int(getattr(pltpu.get_tpu_info(), "vmem_capacity_bytes", 128 << 20))
    except Exception:
        vmem = 128 << 20
    if vmem <= (64 << 20):          # v7x-class: 64 MiB physical VMEM
        return 4 << 20, 48 << 20
    # v5e / v6e: 128 MiB physical.  8 MiB blocks amortize per-step overhead on
    # v6e; explicit 64 MiB limit avoids v5e's 16 MiB scoped default.
    return 8 << 20, 64 << 20


def _sublane_multiple(*dtypes) -> int:
    """Row-tile multiple honoring sublane packing (8 f32, 16 bf16, 32 int8/fp8)."""
    m = 8
    for dt in dtypes:
        isz = np.dtype(dt).itemsize
        m = max(m, 8 * max(1, 4 // max(1, isz)))
    return m


def _row_tile(rows: int, bytes_per_row: int, sub: int, want_split: bool) -> int:
    budget, _ = _vmem_budget()
    max_t = max(sub, budget // max(1, bytes_per_row))
    if want_split and rows >= 2 * sub:
        # Keep >= 2 blocks along the 'parallel' rows axis so the second
        # TensorCore (v7x) has work even when N == 1.
        half = -(-rows // 2)
        half = -(-half // sub) * sub
        max_t = min(max_t, half)
    if rows <= max_t:
        return rows                  # full second-to-last dim -> always layout-legal
    return max(sub, (min(max_t, rows) // sub) * sub)


def _lane_dense(x):
    """NCHW -> (N, C, rows, 128).  Pads the spatial tail only when needed."""
    n, c, h, w = x.shape
    hw = h * w
    if hw % _LANE == 0:
        return x.reshape(n, c, hw // _LANE, _LANE), hw // _LANE, 0
    # TODO(synk): handle the ragged spatial tail in-kernel (masked stores) to
    # avoid this pad/slice round trip; rare for conv feature maps.
    hw_pad = pl.cdiv(hw, _LANE) * _LANE
    rows = hw_pad // _LANE
    xr = jnp.pad(x.reshape(n, c, hw), ((0, 0), (0, 0), (0, hw_pad - hw)))
    return xr.reshape(n, c, rows, _LANE), rows, hw_pad - hw


def _restore_nchw(y, n, c, h, w, rows, pad):
    if pad:
        y = y.reshape(n, c, rows * _LANE)[:, :, : h * w]
    return y.reshape(n, c, h, w)


# --------------------------- forward kernel -----------------------------------
def _fwd_kernel(x_ref, o_ref):
    x = x_ref[...]
    # >= comparison is exact in f32/bf16; only upcast exotic dtypes.
    if x.dtype.name not in ("float32", "bfloat16"):
        x = x.astype(jnp.float32)
    m = jnp.max(x, axis=1, keepdims=True)        # channel max: C-1 elementwise VPU maxes
    o_ref[...] = (x >= m).astype(o_ref.dtype)


def _forward_pallas(x, out_dtype):
    n, c, h, w = x.shape
    xr, rows, pad = _lane_dense(x)
    in_item = np.dtype(x.dtype).itemsize
    out_item = np.dtype(out_dtype).itemsize
    sub = _sublane_multiple(x.dtype, out_dtype)
    t = _row_tile(rows, c * _LANE * (in_item + out_item), sub, want_split=(n == 1))
    grid = (n, pl.cdiv(rows, t))
    _, vmem_limit = _vmem_budget()
    spec = pl.BlockSpec((1, c, t, _LANE), lambda b, r: (b, 0, r, 0))

    out = pl.pallas_call(
        _fwd_kernel,
        out_shape=jax.ShapeDtypeStruct((n, c, rows, _LANE), out_dtype),
        grid=grid,
        in_specs=[spec],
        out_specs=spec,
        compiler_params=pltpu.CompilerParams(
            dimension_semantics=("parallel", "parallel"),
            vmem_limit_bytes=vmem_limit),
        cost_estimate=pl.CostEstimate(
            flops=2 * n * c * rows * _LANE,
            transcendentals=0,
            bytes_accessed=n * c * rows * _LANE * (in_item + out_item)),
    )(xr)
    return _restore_nchw(out, n, c, h, w, rows, pad)


# --------------------------- backward kernel -----------------------------------
def _bwd_kernel(x_ref, g_ref, dx_ref):
    x = x_ref[...].astype(jnp.float32)
    g = g_ref[...].astype(jnp.float32)
    m = jnp.max(x, axis=1, keepdims=True)
    e = jnp.exp(x - m)                                  # EUP slot, essentially free
    u = e / jnp.sum(e, axis=1, keepdims=True)           # softmax over channels
    dot = jnp.sum(u * g, axis=1, keepdims=True)
    dx_ref[...] = (u * (g - dot)).astype(dx_ref.dtype)


def _backward_pallas(x, g):
    n, c, h, w = x.shape
    xr, rows, pad = _lane_dense(x)
    gr, _, _ = _lane_dense(g)
    x_item = np.dtype(x.dtype).itemsize
    g_item = np.dtype(g.dtype).itemsize
    sub = _sublane_multiple(x.dtype, g.dtype)
    t = _row_tile(rows, c * _LANE * (2 * x_item + g_item), sub, want_split=(n == 1))
    grid = (n, pl.cdiv(rows, t))
    _, vmem_limit = _vmem_budget()
    spec = pl.BlockSpec((1, c, t, _LANE), lambda b, r: (b, 0, r, 0))

    dx = pl.pallas_call(
        _bwd_kernel,
        out_shape=jax.ShapeDtypeStruct((n, c, rows, _LANE), x.dtype),
        grid=grid,
        in_specs=[spec, spec],
        out_specs=spec,
        compiler_params=pltpu.CompilerParams(
            dimension_semantics=("parallel", "parallel"),
            vmem_limit_bytes=vmem_limit),
        cost_estimate=pl.CostEstimate(
            flops=8 * n * c * rows * _LANE,
            transcendentals=n * c * rows * _LANE,
            bytes_accessed=n * c * rows * _LANE * (2 * x_item + g_item)),
    )(xr, gr)
    return _restore_nchw(dx, n, c, h, w, rows, pad)


# ---------------------- straight-through estimator wiring ----------------------
def _forward(x, out_dtype, use_pallas):
    if use_pallas:
        return _forward_pallas(x, out_dtype)
    return (x >= jnp.max(x, axis=1, keepdims=True)).astype(out_dtype)


def _backward(x, g, use_pallas):
    if use_pallas:
        return _backward_pallas(x, g)
    u = jax.nn.softmax(x.astype(jnp.float32), axis=1)
    gf = g.astype(jnp.float32)
    return (u * (gf - jnp.sum(u * gf, axis=1, keepdims=True))).astype(x.dtype)


@functools.lru_cache(maxsize=None)
def _make_ste(out_dtype, use_pallas):
    @jax.custom_vjp
    def ste(x):
        return _forward(x, out_dtype, use_pallas)

    def fwd(x):
        return _forward(x, out_dtype, use_pallas), x

    def bwd(x, g):
        # d/dx of (s + u - u.detach()) is the softmax-over-channels VJP.
        return (_backward(x, g, use_pallas),)

    ste.defvjp(fwd, bwd)
    return ste


def discrete_sampler_2d(x: jax.Array, training: bool = True, *,
                        out_dtype=jnp.float32, force_pallas: bool = False) -> jax.Array:
    """Pallas TPU implementation of DiscreteSampler2d.forward (NCHW input).

    Forward value is the channel-argmax indicator s (== s + u - u.detach() up to
    1 ulp); training mode attaches the straight-through softmax gradient.
    `out_dtype` defaults to float32 to match PyTorch's `.float()` contract; pass
    bf16 to halve store-side HBM traffic when the consumer accepts it.
    """
    use_pallas = bool(force_pallas or x.nbytes >= _MIN_PALLAS_BYTES)
    if training:
        return _make_ste(out_dtype, use_pallas)(x)
    return _forward(x, out_dtype, use_pallas)


if __name__ == "__main__":
    key = jax.random.PRNGKey(0)
    k1, k2 = jax.random.split(key)
    # NCHW, matching PyTorch conv-style inputs: batch=2, channels=4, spatial=16x16
    x = jax.random.normal(k1, (2, 4, 16, 16), dtype=jnp.float32)

    def ref_train(xx):
        m = jnp.max(xx, axis=1, keepdims=True)
        s = (xx >= m).astype(jnp.float32)
        u = jax.nn.softmax(xx, axis=1)
        return s + u - jax.lax.stop_gradient(u)

    # training forward (Pallas path forced so the kernel is exercised at this size)
    out = jax.block_until_ready(discrete_sampler_2d(x, training=True, force_pallas=True))
    ref = ref_train(x)
    assert out.shape == ref.shape and out.dtype == ref.dtype
    # s + u - u differs from s by at most ~1 ulp around 1.0
    assert jnp.allclose(out, ref, atol=1e-6, rtol=1e-6)

    # eval mode: exact {0,1} indicator
    s_ref = (x >= jnp.max(x, axis=1, keepdims=True)).astype(jnp.float32)
    out_eval = jax.block_until_ready(discrete_sampler_2d(x, training=False, force_pallas=True))
    assert jnp.array_equal(out_eval, s_ref)

    # small-tensor XLA fallback agrees with the kernel
    out_small = jax.block_until_ready(discrete_sampler_2d(x, training=False))
    assert jnp.array_equal(out_small, s_ref)

    # straight-through gradient (fused Pallas backward kernel) matches reference
    w = jax.random.normal(k2, x.shape, dtype=jnp.float32)
    g_k = jax.grad(lambda xx: jnp.sum(discrete_sampler_2d(xx, True, force_pallas=True) * w))(x)
    g_r = jax.grad(lambda xx: jnp.sum(ref_train(xx) * w))(x)
    assert jnp.allclose(g_k, g_r, atol=1e-5, rtol=1e-5)

    print("KERNEL_OK")
</pallas_src>

<mosaic_0001>
module attributes {stable_mosaic.version = 11 : i64} {
  func.func @_fwd_kernel(%arg0: i32, %arg1: i32, %arg2: memref<1x4x2x128xf32, #tpu.memory_space<vmem>>, %arg3: memref<1x4x2x128xf32, #tpu.memory_space<vmem>>) attributes {dimension_semantics = [#tpu.dimension_semantics<parallel>, #tpu.dimension_semantics<parallel>], iteration_bounds = array<i64: 2, 1>, scalar_prefetch = 0 : i64, scratch_operands = 0 : i64, tpu.core_type = #tpu.core_type<tc>, window_params = [{transform_indices = @transform_0, window_bounds = array<i64: 1, 4, 2, 128>}, {transform_indices = @transform_1, window_bounds = array<i64: 1, 4, 2, 128>}]} {
    %c0 = arith.constant 0 : index
    %c0_0 = arith.constant 0 : index
    %c0_1 = arith.constant 0 : index
    %c0_2 = arith.constant 0 : index
    %0 = vector.load %arg2[%c0, %c0_0, %c0_1, %c0_2] : memref<1x4x2x128xf32, #tpu.memory_space<vmem>>, vector<1x4x2x128xf32>
    %cst = arith.constant dense<0xFF800000> : vector<1x2x128xf32>
    %1 = vector.multi_reduction <maximumf>, %0, %cst [1] : vector<1x4x2x128xf32> to vector<1x2x128xf32>
    %2 = vector.shape_cast %1 : vector<1x2x128xf32> to vector<1x1x2x128xf32>
    %3 = vector.broadcast %2 : vector<1x1x2x128xf32> to vector<1x4x2x128xf32>
    %4 = arith.cmpf oge, %0, %3 : vector<1x4x2x128xf32>
    %5 = arith.extui %4 : vector<1x4x2x128xi1> to vector<1x4x2x128xi32>
    %6 = arith.sitofp %5 : vector<1x4x2x128xi32> to vector<1x4x2x128xf32>
    %c0_3 = arith.constant 0 : index
    %c0_4 = arith.constant 0 : index
    %c0_5 = arith.constant 0 : index
    %c0_6 = arith.constant 0 : index
    %7 = vector.load %arg3[%c0_3, %c0_4, %c0_5, %c0_6] : memref<1x4x2x128xf32, #tpu.memory_space<vmem>>, vector<1x4x2x128xf32>
    tpu.vector_store %arg3[%c0_3, %c0_4, %c0_5, %c0_6], %6 {strides = array<i32>} : memref<1x4x2x128xf32, #tpu.memory_space<vmem>>, vector<1x4x2x128xf32>,
    return
  }
  func.func @transform_0(%arg0: i32, %arg1: i32) -> (i32, i32, i32, i32) {
    %c0_i32 = arith.constant 0 : i32
    %c0_i32_0 = arith.constant 0 : i32
    %c0_i32_1 = arith.constant 0 : i32
    return %arg0, %c0_i32, %arg1, %c0_i32_0 : i32, i32, i32, i32
  }
  func.func @transform_1(%arg0: i32, %arg1: i32) -> (i32, i32, i32, i32) {
    %c0_i32 = arith.constant 0 : i32
    %c0_i32_0 = arith.constant 0 : i32
    %c0_i32_1 = arith.constant 0 : i32
    return %arg0, %c0_i32, %arg1, %c0_i32_0 : i32, i32, i32, i32
  }
}

</mosaic_0001>

<bundles_post_ra>
// kernel: tpu_custom_call.1
= control target key start
LH: loop header
LB: loop body
LE: loop exit
PB: predicated region body
PF: predicated region fallthrough
CT: control target
= control target key end

     0   :  { %6 = vsyncpa [#allocation3], 0  ;;  %s641_s0 = inlined_call_operand.hbm [shape: f32[2,4,2,128], index: 0, kind: input, shape index: {}]   ;;  %s642_s1 = inlined_call_operand.hbm [shape: f32[2,4,2,128], index: 1, kind: output, shape index: {}]  }
   0x1   :  { %8 = vsyncpa [#allocation3 + $0x1], 0 }
   0x2   :  { %9 = vsyncpa [#allocation4], 0 }
   0x3   :  { %11 = vsyncpa [#allocation4 + $0x1], 0  ;;  %s495_s6 = smov 0   ;;  %s497_s7 = smov 0  }
   0x4   :  { %s499_s8 = smov 0   ;;  %s501_s9 = smov 0  }
   0x5   :  { %s503_s10 = smov 0   ;;  %s505_s11 = smov 0  }
   0x6 LB: > { %s280_s12 = sadd.s32 4294967295, %s476_s11   ;;  %s281_s13 = sadd.s32 4294967294, %s476_s11   ;;  %s476_s11 = sphi %s505_s11, %s17_s11   ;;  %s472_s10 = sphi %s503_s10, %s653_s10   ;;  %s468_s9 = sphi %s501_s9, %s652_s9   ;;  %s464_s8 = sphi %s499_s8, %s651_s8   ;;  %s460_s7 = sphi %s497_s7, %s650_s7   ;;  %s456_s6 = sphi %s495_s6, %s649_s6  }
   0x7   : > { %s29_s14 = sadd.s32 1, %s472_s10  ;;  %s38_s15 = sadd.s32 1, %s464_s8 }
   0x8   : > { %p31_p0 = scmp.ge.s32.totalorder %s29_s14, 2  ;;  %p45_p1 = scmp.ne.s32.totalorder %s464_s8, %s460_s7 }
   0x9   : > { %p46_p2 = scmp.eq.s32.totalorder %s476_s11, 0  ;;  %p51_p3 = scmp.ne.s32.totalorder %s460_s7, %s456_s6 }
   0xa   : > { %s655_s14 = smov (%p31_p0, %s29_s14), 0  ;;  %p52_p5 = scmp.eq.s32.totalorder %s280_s12, 0 }
   0xb   : > { %p536_p4 = por %p46_p2, %p45_p1  ;;  %s33_s17 = ssub.s32 %s472_s10, %s655_s14 }
   0xc   : > { %p77_p6 = scmp.eq.s32.totalorder %s280_s12, 1  ;;  %p36_p7 = scmp.eq.s32.totalorder %s33_s17, 0 }
   0xd   : > { %p542_p8 = por %p52_p5, %p51_p3  ;;  %p83_p10 = scmp.eq.s32.totalorder %s281_s13, 1 }
   0xe   : > { %p546_p9 = por %p77_p6, %p45_p1  ;;  %p313_p13 = scmp.lt.s32.totalorder %s476_s11, 2 }
   0xf   : > { %s551_s20 = scalar_select %p36_p7, %s464_s8, %s38_s15  }
  0x10   : > { %p553_p11 = por %p83_p10, %p51_p3  ;;  %s103_s22 = sand.u32 1, %s464_s8  }
  0x11   : > { %s284_s23 = sshll.u32 %s103_s22, 3  ;;  %s299_s24 = sshll.u32 %s472_s10, 7 }
  0x12   : > { %s114_s27 = scalar_lea.hbm %s641_s0, %s299_s24  ;;  %s107_s28 = scalar_lea.vmem [#allocation2], %s284_s23 }
  0x13   : > { %s115_s29 = sshll.u32 %s107_s28, 4  ;;  %p566_p0 = pnand %p313_p13, %p536_p4  ;;  %s116_s29 = int_to_ptr.vmem [resolvable:$true] %s115_s29 }
  0x14   : > { %p287_p1 = scmp.ge.s32.totalorder %s476_s11, 1  ;;  %s104_s2 = scalar_lea.sflag [#allocation3], %s103_s22 }
  0x15   : > { %p370_p2 = pneg %p566_p0  ;;  %s381_s3 = scalar_lea.vmem %s116_s29, 128 }
  0x16   : > { %p382_p3 = scmp.ne.s32.totalorder %s116_s29, %s381_s3  ;;  %s478_s4 = smov [#allocation2]  }
  0x17   : > { %s386_s5 = sshll.u32 %s478_s4, 4  ;;  %s387_s5 = int_to_ptr.vmem [resolvable:$false] %s386_s5 }
  0x18   : > { %p384_p5 = pnand %p382_p3, %p370_p2  ;;  %s388_s12 = scalar_lea.vmem %s387_s5, 256 }
  0x19   : > { %p389_p7 = scmp.lt.s32.totalorder %s116_s29, %s387_s5  ;;  %p390_p10 = scmp.lt.s32.totalorder %s388_s12, %s381_s3 }
  0x1a   : > { %p385_p6 = pneg %p384_p5 }
  0x1b   : > { %p391_p12 = por %p390_p10, %p389_p7 }
  0x1d   : > { %p392_p4 = pnand %p391_p12, %p385_p6 }
  0x1f   : > { %395 = shalt.err (!%p392_p4)
}
  0x20   : > { %s479_s13 = smov 32   ;;  %s480_s15 = smov 2  }
  0x21   : > { %308 = dma.hbm_to_vmem [thread:$0]  (!%p566_p0), %s114_s27, 128, %s116_s29, %s104_s2, %s479_s13, %s479_s13, %s480_s15  }
  0x22   : > { %p123_p13 = scmp.lt.s32.totalorder %s476_s11, 3 }
  0x24   : > { %p124_p2 = pnand %p287_p1, %p123_p13 }
  0x25   : > { %s579_s16 = sand.u32 (!%p124_p2), 1, %s460_s7  }
  0x26   : > { %127 = sbr.rel (%p124_p2) target bundleno = 71 (0x47), region = 24  ;;  %s288_s17 = sshll.u32 (!%p124_p2), %s579_s16, 3 }
  0x27   : > { %s130_s22 = scalar_lea.sflag (!%p124_p2), [#allocation3], %s579_s16  ;;  %s133_s23 = scalar_lea.vmem (!%p124_p2), [#allocation2], %s288_s17 }
  0x2b   : > { %447 = dma.done.wait (%p542_p8), %s130_s22, 128  }
  0x2c   : > { %449 = vsyncadd (%p542_p8), %s130_s22, 4294967168  ;;  %vm156_vm0 = vcmask 1041408   ;;  %v152_v0 = vld [vmem:[%s133_s23] sm:$0x3]  ;;  %v153_v1 = vld [vmem:[%s133_s23 + $0x2] sm:$0x3] }
  0x2d   : > { %v154_v2 = vld [vmem:[%s133_s23 + $0x4] sm:$0x3]  ;;  %v155_v3 = vld [vmem:[%s133_s23 + $0x6] sm:$0x3]  ;;  %v157_v4 = vsel %vm156_vm0, %v152_v0, -inf  ;;  %v158_v5 = vsel %vm156_vm0, %v153_v1, -inf }
  0x2e   : > { %v159_v6 = vsel %vm156_vm0, %v154_v2, -inf  ;;  %v160_v7 = vsel %vm156_vm0, %v155_v3, -inf  ;;  %v161_v8 = vmax.f32 %v157_v4, %v158_v5  ;;  %s151_s24 = scalar_lea.vmem [#allocation5], %s288_s17  ;;  %s300_s26 = sshll.u32 %s468_s9, 7  ;;  %v481_v11 = vmov 0.0  }
  0x2f   : > { %v162_v9 = vmax.f32 %v159_v6, %v160_v7  ;;  %s195_s25 = sshll.u32 %s151_s24, 4  ;;  %s593_s28 = scalar_lea.hbm %s642_s1, %s300_s26  ;;  %s588_s25 = int_to_ptr.vmem [resolvable:$true] %s195_s25 }
  0x30   : > { %s181_s9 = scalar_lea.sflag [#allocation4], %s579_s16  ;;  %s396_s29 = scalar_lea.vmem %s588_s25, 128 }
  0x31   : > { %v163_v10 = vmax.f32 %v161_v8, %v162_v9  ;;  %p397_p8 = scmp.ne.s32.totalorder %s588_s25, %s396_s29  ;;  %s482_s30 = smov [#allocation5]  }
  0x32   : > { %s400_s2 = sshll.u32 %s482_s30, 4  ;;  %s401_s2 = int_to_ptr.vmem [resolvable:$false] %s400_s2 }
  0x33   : > { %vm164_vm1 = vcmp.ge.f32.partialorder %v152_v0, %v163_v10  ;;  %vm165_vm2 = vcmp.ge.f32.partialorder %v153_v1, %v163_v10  ;;  %vm166_vm3 = vcmp.ge.f32.partialorder %v154_v2, %v163_v10  ;;  %vm167_vm4 = vcmp.ge.f32.partialorder %v155_v3, %v163_v10  ;;  %p398_p12 = pnand %p397_p8, %p546_p9  ;;  %s402_s3 = scalar_lea.vmem %s401_s2, 256 }
  0x34   : > { %v290_v12 = vsel %vm164_vm1, 1.0, %v481_v11  ;;  %v291_v13 = vsel %vm165_vm2, 1.0, %v481_v11  ;;  %v292_v14 = vsel %vm166_vm3, 1.0, %v481_v11  ;;  %v293_v15 = vsel %vm167_vm4, 1.0, %v481_v11  ;;  %p403_p1 = scmp.lt.s32.totalorder %s588_s25, %s401_s2  ;;  %p404_p3 = scmp.lt.s32.totalorder %s402_s3, %s396_s29 }
  0x35   : > { %176 = vst [vmem:[%s151_s24] sm:$0x3] %v290_v12  ;;  %177 = vst [vmem:[%s151_s24 + $0x2] sm:$0x3] %v291_v13  ;;  %p399_p0 = pneg %p398_p12 }
  0x36   : > { %178 = vst [vmem:[%s151_s24 + $0x4] sm:$0x3] %v292_v14  ;;  %179 = vst [vmem:[%s151_s24 + $0x6] sm:$0x3] %v293_v15  ;;  %p405_p5 = por %p404_p3, %p403_p1 }
  0x38   : > { %p406_p6 = pnand %p405_p5, %p399_p0 }
  0x3a   : > { %409 = shalt.err (!%p406_p6)
}
  0x3b   : > { %s410_s4 = scalar_lea.hbm %s593_s28, 128  ;;  %s414_s13 = scalar_lea.hbm %s642_s1, 256 }
  0x3c   : > { %p411_p7 = scmp.ne.s32.totalorder %s593_s28, %s410_s4  ;;  %p415_p13 = scmp.lt.s32.totalorder %s593_s28, %s642_s1 }
  0x3d   : > { %p416_p2 = scmp.lt.s32.totalorder %s414_s13, %s410_s4 }
  0x3e   : > { %p412_p10 = pnand %p411_p7, %p546_p9 }
  0x3f   : > { %p417_p8 = por %p416_p2, %p415_p13 }
  0x40   : > { %p413_p4 = pneg %p412_p10 }
  0x42   : > { %p418_p12 = pnand %p417_p8, %p413_p4 }
  0x44   : > { %421 = shalt.err (!%p418_p12)
}
  0x45   : > { %s483_s22 = smov 32   ;;  %s484_s23 = smov 2  }
  0x46   : > { %303 = dma.vmem_to_hbm [thread:$0]  (%p546_p9), %s588_s25, 128, %s593_s28, %s181_s9, %s483_s22, %s483_s22, %s484_s23  }
  0x47 PF: > { %s210_s24 = sand.u32 1, %s456_s6   ;;  %p648_p0 = scmp.ge.s32.totalorder %s476_s11, 2 }
  0x48   : > { %s211_s26 = scalar_lea.sflag [#allocation4], %s210_s24 }
  0x49   : > { %p310_p1 = pnand %p648_p0, %p553_p11 }
  0x4b   : > { %p311_p3 = pneg %p310_p1 }
  0x4d   : > { %451 = dma.done.wait (%p311_p3), %s211_s26, 128  }
  0x4e   : > { %453 = vsyncadd (%p311_p3), %s211_s26, 4294967168  ;;  %s17_s11 = sadd.s32 1, %s476_s11   ;;  %s649_s6 = smov %s460_s7 }
  0x4f   : > { %p14_p5 = scmp.ge.s32.totalorder %s17_s11, 4   ;;  %s650_s7 = smov %s464_s8 }
  0x50   : > { %s651_s8 = smov %s551_s20  ;;  %s652_s9 = smov %s472_s10 }
  0x51   : > { %s653_s10 = smov %s655_s14  ;;  %16 = sbr.rel (!%p14_p5) target bundleno = 6 (0x6), region = 69 }
  0x56   :  { %216 = vsyncpa [#allocation3], 1 }
  0x57   :  { %218 = vsyncpa [#allocation3 + $0x1], 1 }
  0x58   :  { %219 = vsyncpa [#allocation4], 1 }
  0x59   :  { %221 = vsyncpa [#allocation4 + $0x1], 1 }

</bundles_post_ra>
